<compile_context>
chip_gen: v5e
topology: v5e:2x2
jax: 0.10.0
libtpu: 0.0.40
codegen_flags: <defaults>
</compile_context>

<pallas_src>
import functools

import jax
import jax.numpy as jnp
from jax import lax
from jax.experimental import pallas as pl
from jax.experimental.pallas import tpu as pltpu


def norm2d_kernel(x_ref, w_ref, b_ref, o_ref, *, eps, inv_c):
    # x_ref: (1, C, TS)   w_ref: (C, 1)   b_ref: (C, 1)   o_ref: (1, C, TS)
    x = x_ref[0].astype(jnp.float32)                       # (C, TS)

    # One-pass statistics over C (sublane axis): E[x], E[x^2].
    s1 = jnp.sum(x, axis=0, keepdims=True)                 # (1, TS)
    s2 = jnp.sum(x * x, axis=0, keepdims=True)             # (1, TS)
    mean = s1 * inv_c
    var = jnp.maximum(s2 * inv_c - mean * mean, 0.0)       # clamp roundoff
    inv = lax.rsqrt(var + eps)                             # (1, TS), EUP slot

    # y = (x - mean) * inv * w + b  ==  x * scale + shift   (fused, no xc temp)
    scale = inv * w_ref[...]                               # (1,TS)*(C,1) -> (C,TS)
    shift = b_ref[...] - mean * scale                      # (C,1) - (1,TS)*(C,TS)
    o_ref[0] = (x * scale + shift).astype(o_ref.dtype)


def _pick_spatial_tile(hw_pad, max_elems, min_tiles):
    """Largest multiple-of-128 divisor of hw_pad with TS<=max_elems and
    hw_pad//TS >= min_tiles.  hw_pad is guaranteed to be a multiple of 128."""
    m = hw_pad // 128
    cap = min(max_elems, hw_pad // max(min_tiles, 1))
    best = 128
    for d in range(1, m + 1):
        if m % d == 0:
            ts = 128 * d
            if ts <= cap:
                best = ts
    return best


def norm2d(x, weight, bias, *, eps=1e-6):
    """x: (B, C, H, W); weight, bias: (C,) LayerNorm affine params over C."""
    B, C, H, W = x.shape
    HW = H * W

    # Free contiguous reshape (no transpose, no extra HBM traffic).
    x3 = x.reshape(B, C, HW)

    # Pad the spatial axis up to a multiple of 128 so every tile (and every
    # output store) is lane-dense.  Padded columns produce garbage-free,
    # finite values (mean=0, var=0 -> rsqrt(eps)) and are sliced off below.
    HW_pad = pl.cdiv(HW, 128) * 128
    if HW_pad != HW:
        x3 = jnp.pad(x3, ((0, 0), (0, 0), (0, HW_pad - HW)))

    w2 = weight.reshape(C, 1).astype(jnp.float32)
    b2 = bias.reshape(C, 1).astype(jnp.float32)

    # --- VMEM byte budget for the spatial tile -----------------------------
    # Per element of a (C, TS) block:
    #   I/O blocks, double-buffered:  2*(in + out)      = 4 * itemsize
    #   in-kernel f32 temporaries (x upcast, scale/shift, y): ~3 * 4 bytes
    # Keep the total under ~24 MiB (we request a 32 MiB scoped VMEM limit,
    # which is safe on every generation: v5e/v6e 128 MiB, v7x 64 MiB phys).
    itemsize = jnp.dtype(x.dtype).itemsize
    bytes_per_elem = 4 * itemsize + 3 * 4
    vmem_budget = 24 * 1024 * 1024
    max_ts = max(128, vmem_budget // (bytes_per_elem * C))

    # Ensure >= 2 total grid steps so both v7x TensorCores get work.
    min_spatial_tiles = 1 if B >= 2 else (2 if HW_pad >= 256 else 1)

    TS = _pick_spatial_tile(HW_pad, max_ts, min_spatial_tiles)
    grid = (B, HW_pad // TS)

    cost = pl.CostEstimate(
        flops=int(7 * B * C * HW_pad),
        transcendentals=int(B * HW_pad),
        bytes_accessed=int(itemsize * 2 * B * C * HW_pad + 4 * 2 * C),
    )

    # TODO(synk): if profiling shows exposed DMA latency at very small C
    # (sub-1 MiB blocks), add pipeline_mode=pl.Buffered(3) on the activation
    # in/out specs.
    out = pl.pallas_call(
        functools.partial(norm2d_kernel, eps=eps, inv_c=1.0 / C),
        out_shape=jax.ShapeDtypeStruct((B, C, HW_pad), x.dtype),
        grid_spec=pltpu.PrefetchScalarGridSpec(
            num_scalar_prefetch=0,
            grid=grid,
            in_specs=[
                pl.BlockSpec((1, C, TS), lambda b, s: (b, 0, s)),  # activations
                pl.BlockSpec((C, 1), lambda b, s: (0, 0)),         # gamma (grid-invariant)
                pl.BlockSpec((C, 1), lambda b, s: (0, 0)),         # beta  (grid-invariant)
            ],
            out_specs=pl.BlockSpec((1, C, TS), lambda b, s: (b, 0, s)),
        ),
        compiler_params=pltpu.CompilerParams(
            dimension_semantics=("parallel", "parallel"),
            vmem_limit_bytes=32 * 1024 * 1024,
        ),
        cost_estimate=cost,
    )(x3, w2, b2)

    if HW_pad != HW:
        out = out[:, :, :HW]
    return out.reshape(B, C, H, W)


def _reference(x, weight, bias, *, eps=1e-6):
    # Pure-JAX mirror of the PyTorch forward: NCHW -> NHWC -> LayerNorm(C) -> NCHW.
    xt = jnp.transpose(x, (0, 2, 3, 1)).astype(jnp.float32)
    mean = xt.mean(axis=-1, keepdims=True)
    var = ((xt - mean) ** 2).mean(axis=-1, keepdims=True)
    y = (xt - mean) / jnp.sqrt(var + eps) * weight + bias
    return jnp.transpose(y, (0, 3, 1, 2)).astype(x.dtype)


if __name__ == "__main__":
    # Small shapes consistent with the module: B=2, embed_dim=32, 16x16 feature map.
    B, C, H, W = 2, 32, 16, 16

    key = jax.random.PRNGKey(0)
    kx, kw, kb = jax.random.split(key, 3)
    x = jax.random.normal(kx, (B, C, H, W), dtype=jnp.float32)
    weight = 1.0 + 0.1 * jax.random.normal(kw, (C,), dtype=jnp.float32)
    bias = 0.1 * jax.random.normal(kb, (C,), dtype=jnp.float32)

    out = norm2d(x, weight, bias)
    out = jax.block_until_ready(out)

    ref = _reference(x, weight, bias)
    assert out.shape == (B, C, H, W), out.shape
    assert jnp.allclose(out, ref, atol=1e-4, rtol=1e-4), float(jnp.abs(out - ref).max())

    # Also exercise the non-multiple-of-128 spatial path (14x14=196 -> padded to 256).
    H2 = W2 = 14
    x2 = jax.random.normal(kx, (1, C, H2, W2), dtype=jnp.float32)
    out2 = jax.block_until_ready(norm2d(x2, weight, bias))
    ref2 = _reference(x2, weight, bias)
    assert jnp.allclose(out2, ref2, atol=1e-4, rtol=1e-4), float(jnp.abs(out2 - ref2).max())

    print("KERNEL_OK")
</pallas_src>

<mosaic_0001>
module attributes {stable_mosaic.version = 11 : i64} {
  func.func @norm2d_kernel(%arg0: i32, %arg1: i32, %arg2: memref<1x32x256xf32, #tpu.memory_space<vmem>>, %arg3: memref<32x1xf32, #tpu.memory_space<vmem>>, %arg4: memref<32x1xf32, #tpu.memory_space<vmem>>, %arg5: memref<1x32x256xf32, #tpu.memory_space<vmem>>) attributes {dimension_semantics = [#tpu.dimension_semantics<parallel>, #tpu.dimension_semantics<parallel>], iteration_bounds = array<i64: 2, 1>, scalar_prefetch = 0 : i64, scratch_operands = 0 : i64, tpu.core_type = #tpu.core_type<tc>, window_params = [{transform_indices = @transform_0, window_bounds = array<i64: 1, 32, 256>}, {pipeline_mode = #tpu.pipeline_mode<synchronous>, transform_indices = @transform_1, window_bounds = array<i64: 32, 1>}, {pipeline_mode = #tpu.pipeline_mode<synchronous>, transform_indices = @transform_2, window_bounds = array<i64: 32, 1>}, {transform_indices = @transform_3, window_bounds = array<i64: 1, 32, 256>}]} {
    %c0 = arith.constant 0 : index
    %c0_0 = arith.constant 0 : index
    %c0_1 = arith.constant 0 : index
    %0 = vector.load %arg2[%c0, %c0_0, %c0_1] : memref<1x32x256xf32, #tpu.memory_space<vmem>>, vector<1x32x256xf32>
    %1 = vector.shape_cast %0 : vector<1x32x256xf32> to vector<32x256xf32>
    %cst = arith.constant dense<0.000000e+00> : vector<256xf32>
    %2 = vector.multi_reduction <add>, %1, %cst [0] : vector<32x256xf32> to vector<256xf32>
    %3 = vector.shape_cast %2 : vector<256xf32> to vector<1x256xf32>
    %4 = arith.mulf %1, %1 : vector<32x256xf32>
    %cst_2 = arith.constant dense<0.000000e+00> : vector<256xf32>
    %5 = vector.multi_reduction <add>, %4, %cst_2 [0] : vector<32x256xf32> to vector<256xf32>
    %6 = vector.shape_cast %5 : vector<256xf32> to vector<1x256xf32>
    %cst_3 = arith.constant 3.125000e-02 : f32
    %7 = vector.broadcast %cst_3 : f32 to vector<1x256xf32>
    %8 = arith.mulf %3, %7 : vector<1x256xf32>
    %cst_4 = arith.constant 3.125000e-02 : f32
    %9 = vector.broadcast %cst_4 : f32 to vector<1x256xf32>
    %10 = arith.mulf %6, %9 : vector<1x256xf32>
    %11 = arith.mulf %8, %8 : vector<1x256xf32>
    %12 = arith.subf %10, %11 : vector<1x256xf32>
    %cst_5 = arith.constant 0.000000e+00 : f32
    %13 = vector.broadcast %cst_5 : f32 to vector<1x256xf32>
    %14 = arith.maximumf %12, %13 : vector<1x256xf32>
    %cst_6 = arith.constant 9.99999997E-7 : f32
    %15 = vector.broadcast %cst_6 : f32 to vector<1x256xf32>
    %16 = arith.addf %14, %15 : vector<1x256xf32>
    %17 = math.rsqrt %16 : vector<1x256xf32>
    %c0_7 = arith.constant 0 : index
    %c0_8 = arith.constant 0 : index
    %18 = vector.load %arg3[%c0_7, %c0_8] : memref<32x1xf32, #tpu.memory_space<vmem>>, vector<32x1xf32>
    %19 = vector.broadcast %17 : vector<1x256xf32> to vector<32x256xf32>
    %20 = vector.broadcast %18 : vector<32x1xf32> to vector<32x256xf32>
    %21 = arith.mulf %19, %20 : vector<32x256xf32>
    %c0_9 = arith.constant 0 : index
    %c0_10 = arith.constant 0 : index
    %22 = vector.load %arg4[%c0_9, %c0_10] : memref<32x1xf32, #tpu.memory_space<vmem>>, vector<32x1xf32>
    %23 = vector.broadcast %8 : vector<1x256xf32> to vector<32x256xf32>
    %24 = arith.mulf %23, %21 : vector<32x256xf32>
    %25 = vector.broadcast %22 : vector<32x1xf32> to vector<32x256xf32>
    %26 = arith.subf %25, %24 : vector<32x256xf32>
    %27 = arith.mulf %1, %21 : vector<32x256xf32>
    %28 = arith.addf %27, %26 : vector<32x256xf32>
    %c0_11 = arith.constant 0 : index
    %c0_12 = arith.constant 0 : index
    %c0_13 = arith.constant 0 : index
    %29 = vector.load %arg5[%c0_11, %c0_12, %c0_13] : memref<1x32x256xf32, #tpu.memory_space<vmem>>, vector<1x32x256xf32>
    %30 = vector.shape_cast %29 : vector<1x32x256xf32> to vector<32x256xf32>
    %31 = vector.shape_cast %28 : vector<32x256xf32> to vector<1x32x256xf32>
    tpu.vector_store %arg5[%c0_11, %c0_12, %c0_13], %31 {strides = array<i32>} : memref<1x32x256xf32, #tpu.memory_space<vmem>>, vector<1x32x256xf32>,
    return
  }
  func.func @transform_0(%arg0: i32, %arg1: i32) -> (i32, i32, i32) {
    %c0_i32 = arith.constant 0 : i32
    %c0_i32_0 = arith.constant 0 : i32
    return %arg0, %c0_i32, %arg1 : i32, i32, i32
  }
  func.func @transform_1(%arg0: i32, %arg1: i32) -> (i32, i32) {
    %c0_i32 = arith.constant 0 : i32
    %c0_i32_0 = arith.constant 0 : i32
    %c0_i32_1 = arith.constant 0 : i32
    return %c0_i32, %c0_i32_0 : i32, i32
  }
  func.func @transform_2(%arg0: i32, %arg1: i32) -> (i32, i32) {
    %c0_i32 = arith.constant 0 : i32
    %c0_i32_0 = arith.constant 0 : i32
    %c0_i32_1 = arith.constant 0 : i32
    return %c0_i32, %c0_i32_0 : i32, i32
  }
  func.func @transform_3(%arg0: i32, %arg1: i32) -> (i32, i32, i32) {
    %c0_i32 = arith.constant 0 : i32
    %c0_i32_0 = arith.constant 0 : i32
    return %arg0, %c0_i32, %arg1 : i32, i32, i32
  }
}

</mosaic_0001>

<bundles_post_ra>
// kernel: tpu_custom_call.1
= control target key start
LH: loop header
LB: loop body
LE: loop exit
PB: predicated region body
PF: predicated region fallthrough
CT: control target
= control target key end

     0   :  { %8 = vsyncpa [#allocation3], 0  ;;  %s959_s0 = inlined_call_operand.hbm [shape: f32[2,32,256], index: 0, kind: input, shape index: {}]   ;;  %s960_s1 = inlined_call_operand.vmem [shape: f32[32,1], index: 1, kind: input, shape index: {}]   ;;  %s961_s2 = inlined_call_operand.vmem [shape: f32[32,1], index: 2, kind: input, shape index: {}]   ;;  %s962_s3 = inlined_call_operand.hbm [shape: f32[2,32,256], index: 3, kind: output, shape index: {}]  }
   0x1   :  { %10 = vsyncpa [#allocation3 + $0x1], 0 }
   0x2   :  { %11 = vsyncpa [#allocation4], 0 }
   0x3   :  { %13 = vsyncpa [#allocation4 + $0x1], 0  ;;  %s726_s12 = smov 0   ;;  %s728_s13 = smov 0  }
   0x4   :  { %s730_s14 = smov 0   ;;  %s732_s15 = smov 0  }
   0x5   :  { %s734_s16 = smov 0   ;;  %s736_s17 = smov 0  }
   0x6 LB: > { %s496_s18 = sadd.s32 4294967295, %s699_s17   ;;  %s497_s19 = sadd.s32 4294967294, %s699_s17   ;;  %s699_s17 = sphi %s736_s17, %s19_s17   ;;  %s695_s16 = sphi %s734_s16, %s971_s16   ;;  %s691_s15 = sphi %s732_s15, %s970_s15   ;;  %s687_s14 = sphi %s730_s14, %s969_s14   ;;  %s683_s13 = sphi %s728_s13, %s968_s13   ;;  %s679_s12 = sphi %s726_s12, %s967_s12  }
   0x7   : > { %s31_s20 = sadd.s32 1, %s695_s16  ;;  %s40_s21 = sadd.s32 1, %s687_s14 }
   0x8   : > { %p33_p0 = scmp.ge.s32.totalorder %s31_s20, 2  ;;  %p47_p1 = scmp.ne.s32.totalorder %s687_s14, %s683_s13 }
   0x9   : > { %p48_p2 = scmp.eq.s32.totalorder %s699_s17, 0  ;;  %p53_p3 = scmp.ne.s32.totalorder %s683_s13, %s679_s12 }
   0xa   : > { %s973_s20 = smov (%p33_p0, %s31_s20), 0  ;;  %p54_p5 = scmp.eq.s32.totalorder %s496_s18, 0 }
   0xb   : > { %p767_p4 = por %p48_p2, %p47_p1  ;;  %s35_s23 = ssub.s32 %s695_s16, %s973_s20 }
   0xc   : > { %p121_p6 = scmp.eq.s32.totalorder %s496_s18, 1  ;;  %p38_p7 = scmp.eq.s32.totalorder %s35_s23, 0 }
   0xd   : > { %p773_p8 = por %p54_p5, %p53_p3  ;;  %p127_p10 = scmp.eq.s32.totalorder %s497_s19, 1 }
   0xe   : > { %p777_p9 = por %p121_p6, %p47_p1  ;;  %p499_p12 = scmp.ge.s32.totalorder %s699_s17, 2 }
   0xf   : > { %s782_s26 = scalar_select %p38_p7, %s687_s14, %s40_s21  }
  0x10   : > { %p784_p11 = por %p127_p10, %p53_p3  ;;  %p525_p13 = scmp.lt.s32.totalorder %s699_s17, 2 }
  0x11   : > { %s153_s28 = sand.u32 1, %s687_s14   ;;  %s511_s30 = sshll.u32 %s695_s16, 6 }
  0x12   : > { %s500_s29 = sshll.u32 %s153_s28, 6  ;;  %s164_s6 = scalar_lea.hbm %s959_s0, %s511_s30 }
  0x13   : > { %s157_s7 = scalar_lea.vmem [#allocation2], %s500_s29  ;;  %s165_s9 = sshll.u32 %s164_s6, 4  ;;  %s166_s9 = int_to_ptr.hbm [resolvable:$true] %s165_s9 }
  0x14   : > { %s167_s8 = sshll.u32 %s157_s7, 4  ;;  %p518_p0 = pnand %p525_p13, %p767_p4  ;;  %s168_s8 = int_to_ptr.vmem [resolvable:$true] %s167_s8 }
  0x15   : > { %p503_p1 = scmp.ge.s32.totalorder %s699_s17, 1  ;;  %s154_s10 = scalar_lea.sflag [#allocation3], %s153_s28 }
  0x16   : > { %s701_s11 = smov 256   ;;  %s702_s18 = smov 16  }
  0x17   : > { %520 = dma.hbm_to_vmem [thread:$0]  (!%p518_p0), %s166_s9, 1024, %s168_s8, %s154_s10, %s701_s11, %s701_s11, %s702_s18  }
  0x18   : > { %p175_p2 = scmp.lt.s32.totalorder %s699_s17, 3 }
  0x1a   : > { %p176_p3 = pnand %p503_p1, %p175_p2 }
  0x1b   : > { %s800_s19 = sand.u32 (!%p176_p3), 1, %s683_s13  }
  0x1c   : > { %179 = sbr.rel (%p176_p3) target bundleno = 178 (0xb2), region = 32  ;;  %s504_s21 = sshll.u32 (!%p176_p3), %s800_s19, 6 }
  0x1d   : > { %s182_s23 = scalar_lea.sflag (!%p176_p3), [#allocation3], %s800_s19  ;;  %s806_s22 = scalar_lea.vmem (!%p176_p3), [#allocation2], %s504_s21 }
  0x21   : > { %670 = dma.done.wait (%p773_p8), %s182_s23, 1024  }
  0x22   : > { %672 = vsyncadd (%p773_p8), %s182_s23, 4294966272  ;;  %v703_v0 = vmov 0   ;;  %v297_v1 = vld [vmem:[%s960_s1 + $0x10] sm:$0xff]  ;;  %v295_v2 = vld [vmem:[%s960_s1] sm:$0xff]  ;;  %s512_s30 = sshll.u32 %s691_s15, 6  ;;  %s392_s6 = scalar_lea.sflag [#allocation4], %s800_s19 }
  0x23   : > { %581 = vset.pattern.permute.xlu1 %v703_v0  ;;  %580 = vset.pattern.permute.xlu0 %v703_v0  ;;  %v327_v3 = vld [vmem:[%s961_s2] sm:$0xff]  ;;  %v298_v4 = vld [vmem:[%s960_s1 + $0x18] sm:$0xff]  ;;  %v296_v5 = vld [vmem:[%s960_s1 + $0x8] sm:$0xff]  ;;  %s405_s4 = scalar_lea.hbm %s962_s3, %s512_s30  ;;  %s637_s11 = scalar_lea.hbm %s962_s3, 128 }
  0x24   : > { %582 = vset.pattern.permute.xlu2 %v703_v0  ;;  %311 = vperm.xlu1 %581, %v297_v1   ;;  %v328_v6 = vld [vmem:[%s961_s2 + $0x8] sm:$0xff]  ;;  %v330_v7 = vld [vmem:[%s961_s2 + $0x18] sm:$0xff]  ;;  %v329_v8 = vld [vmem:[%s961_s2 + $0x10] sm:$0xff]  ;;  %s408_s24 = sshll.u32 %s405_s4, 4  ;;  %s409_s24 = int_to_ptr.hbm [resolvable:$true] %s408_s24 }
  0x25   : > { %301 = vperm.xlu0 %580, %v295_v2   ;;  %341 = vperm.xlu2 %582, %v327_v3   ;;  %v837_v9 = vld [vmem:[%s806_s22] sm:$0xff]  ;;  %v840_v10 = vld [vmem:[%s806_s22 + $0x8] sm:$0xff]  ;;  %v843_v11 = vld [vmem:[%s806_s22 + $0x10] sm:$0xff]  ;;  %s631_s7 = sshra.s32 %s409_s24, 4  ;;  %s632_s7 = int_to_ptr.hbm [resolvable:$true] %s631_s7 }
  0x26   : > { %v846_v12 = vld [vmem:[%s806_s22 + $0x18] sm:$0xff]  ;;  %v219_v13 = vadd.f32 %v843_v11, %v837_v9  ;;  %v237_v14 = vmul.f32 %v837_v9, %v837_v9  ;;  %v238_v15 = vmul.f32 %v840_v10, %v840_v10  ;;  %v239_v16 = vmul.f32 %v843_v11, %v843_v11  ;;  %v857_v17 = vld [vmem:[%s806_s22 + $0x20] sm:$0xff]  ;;  %v860_v18 = vld [vmem:[%s806_s22 + $0x28] sm:$0xff]  ;;  %s633_s8 = scalar_lea.hbm %s632_s7, 64  ;;  %p638_p7 = scmp.lt.s32.totalorder %s632_s7, %s962_s3 }
  0x27   : > { %v228_v19 = vadd.f32 %v846_v12, %v840_v10  ;;  %v240_v20 = vmul.f32 %v846_v12, %v846_v12  ;;  %v241_v22 = vmul.f32 %v857_v17, %v857_v17  ;;  %v242_v23 = vmul.f32 %v860_v18, %v860_v18  ;;  %v872_v25 = vld [vmem:[%s806_s22 + $0x30] sm:$0xff]  ;;  %v875_v26 = vld [vmem:[%s806_s22 + $0x38] sm:$0xff]  ;;  %s898_s22 = scalar_lea.vmem [#allocation5], %s504_s21  ;;  %p634_p4 = scmp.ne.s32.totalorder %s632_s7, %s633_s8 }
  0x28   : > { %v220_v21 = vadd.f32 %v219_v13, %v857_v17  ;;  %v245_v24 = vadd.f32 %v239_v16, %v237_v14  ;;  %v243_v30 = vmul.f32 %v872_v25, %v872_v25  ;;  %v244_v31 = vmul.f32 %v875_v26, %v875_v26  ;;  %s406_s5 = sshll.u32 %s898_s22, 4  ;;  %p639_p8 = scmp.lt.s32.totalorder %s637_s11, %s633_s8  ;;  %s407_s5 = int_to_ptr.vmem [resolvable:$true] %s406_s5 }
  0x29   : > { %v229_v27 = vadd.f32 %v228_v19, %v860_v18  ;;  %v254_v28 = vadd.f32 %v240_v20, %v238_v15  ;;  %p635_p5 = pnand %p634_p4, %p777_p9 }
  0x2a   : > { %v221_v29 = vadd.f32 %v220_v21, %v872_v25  ;;  %v246_v32 = vadd.f32 %v245_v24, %v241_v22  ;;  %p640_p10 = por %p639_p8, %p638_p7 }
  0x2b   : > { %v230_v33 = vadd.f32 %v229_v27, %v875_v26  ;;  %v255_v34 = vadd.f32 %v254_v28, %v242_v23  ;;  %p636_p6 = pneg %p635_p5 }
  0x2c   : > { %316 = vperm.xlu1 %581, %v298_v4   ;;  %v222_v35 = vrot.slane %v221_v29, 4  ;;  %v247_v36 = vadd.f32 %v246_v32, %v243_v30 }
  0x2d   : > { %306 = vperm.xlu0 %580, %v296_v5   ;;  %346 = vperm.xlu2 %582, %v328_v6   ;;  %v231_v37 = vrot.slane %v230_v33, 4  ;;  %v256_v38 = vadd.f32 %v255_v34, %v244_v31  ;;  %p641_p13 = pnand %p640_p10, %p636_p6 }
  0x2e   : > { %v223_v39 = vadd.f32 %v222_v35, %v221_v29  ;;  %v248_v40 = vrot.slane %v247_v36, 4 }
  0x2f   : > { %v232_v41 = vadd.f32 %v231_v37, %v230_v33  ;;  %v257_v42 = vrot.slane %v256_v38, 4 }
  0x30   : > { %v224_v43 = vrot.slane %v223_v39, 2  ;;  %v249_v44 = vadd.f32 %v248_v40, %v247_v36 }
  0x31   : > { %v233_v45 = vrot.slane %v232_v41, 2  ;;  %v258_v46 = vadd.f32 %v257_v42, %v256_v38 }
  0x32   : > { %v225_v47 = vadd.f32 %v224_v43, %v223_v39  ;;  %v250_v48 = vrot.slane %v249_v44, 2 }
  0x33   : > { %v234_v49 = vadd.f32 %v233_v45, %v232_v41  ;;  %v259_v50 = vrot.slane %v258_v46, 2 }
  0x34   : > { %356 = vperm.xlu1 %581, %v330_v7   ;;  %v226_v51 = vrot.slane %v225_v47, 1  ;;  %v251_v52 = vadd.f32 %v250_v48, %v249_v44 }
  0x35   : > { %351 = vperm.xlu0 %580, %v329_v8   ;;  %v235_v53 = vrot.slane %v234_v49, 1  ;;  %v260_v54 = vadd.f32 %v259_v50, %v258_v46 }
  0x36   : > { %v227_v55 = vadd.f32 %v226_v51, %v225_v47  ;;  %v252_v56 = vrot.slane %v251_v52, 1 }
  0x37   : > { %v236_v57 = vadd.f32 %v235_v53, %v234_v49  ;;  %v261_v58 = vrot.slane %v260_v54, 1 }
  0x38   : > { %v253_v59 = vadd.f32 %v252_v56, %v251_v52  ;;  %v884_v60 = vmul.f32 0.03125, %v227_v55 }
  0x39   : > { %v262_v61 = vadd.f32 %v261_v58, %v260_v54  ;;  %v886_v62 = vmul.f32 0.03125, %v236_v57 }
  0x3a   : > { %v265_v63 = vmul.f32 0.03125, %v253_v59  ;;  %v267_v0 = vmul.f32 %v884_v60, %v884_v60 }
  0x3b   : > { %v266_v1 = vmul.f32 0.03125, %v262_v61  ;;  %v268_v2 = vmul.f32 %v886_v62, %v886_v62 }
  0x3c   : > { %v269_v3 = vsub.f32 %v265_v63, %v267_v0 }
  0x3d   : > { %v270_v4 = vsub.f32 %v266_v1, %v268_v2 }
  0x3e   : > { %v271_v5 = vmax.f32 %v269_v3, 0.0 }
  0x3f   : > { %v272_v6 = vmax.f32 %v270_v4, 0.0 }
  0x40   : > { %v273_v7 = vadd.f32 1e-06, %v271_v5 }
  0x41   : > { %v274_v8 = vadd.f32 1e-06, %v272_v6 }
  0x42   : > { %583 = vrsqrt.f32 %v273_v7  ;;  %vm281_vm0 = vweird.f32 %v273_v7 }
  0x43   : > { %585 = vrsqrt.f32 %v274_v8  ;;  %vm291_vm2 = vweird.f32 %v274_v8 }
  0x48   : > { %v584_v13 = vpop.eup %583 }
  0x49   : > { %v586_v14 = vpop.eup %585  ;;  %v276_v15 = vmul.f32 %v584_v13, %v273_v7  ;;  %vm282_vm1 = vweird.f32 %v584_v13 }
  0x4a   : > { %v286_v16 = vmul.f32 %v586_v14, %v274_v8  ;;  %vm292_vm3 = vweird.f32 %v586_v14  ;;  %vm283_vm4 = vmor %vm281_vm0, %vm282_vm1 }
  0x4b   : > { %v277_v19 = vmul.f32 %v584_v13, %v276_v15  ;;  %vm293_vm5 = vmor %vm291_vm2, %vm292_vm3 }
  0x4c   : > { %v287_v20 = vmul.f32 %v586_v14, %v286_v16 }
  0x4d   : > { %v278_v21 = vmul.f32 0.5, %v277_v19 }
  0x4e   : > { %v288_v22 = vmul.f32 0.5, %v287_v20 }
  0x4f   : > { %v279_v23 = vsub.f32 1.5, %v278_v21 }
  0x50   : > { %v289_v24 = vsub.f32 1.5, %v288_v22 }
  0x51   : > { %v280_v27 = vmul.f32 %v584_v13, %v279_v23 }
  0x52   : > { %v290_v28 = vmul.f32 %v586_v14, %v289_v24 }
  0x53   : > { %v284_v29 = vsel %vm283_vm4, %v584_v13, %v280_v27 }
  0x54   : > { %v294_v30 = vsel %vm293_vm5, %v586_v14, %v290_v28 }
  0x7f   : > { %v342_v35 = vpop.permute.xlu2 %341 }
  0x87   : > { %v347_v52 = vpop.permute.xlu2 %346 }
  0x96   : > { %v312_v31 = vpop.permute.xlu1 %311 }
  0x97   : > { %v302_v32 = vpop.permute.xlu0 %301  ;;  %v323_v48 = vmul.f32 %v312_v31, %v284_v29  ;;  %v324_v49 = vmul.f32 %v312_v31, %v294_v30 }
  0x98   : > { %v319_v33 = vmul.f32 %v302_v32, %v284_v29  ;;  %v320_v34 = vmul.f32 %v302_v32, %v294_v30 }
  0x99   : > { %v335_v57 = vmul.f32 %v323_v48, %v884_v60  ;;  %v336_v58 = vmul.f32 %v324_v49, %v886_v62  ;;  %v372_v6 = vmul.f32 %v324_v49, %v860_v18 }
  0x9a   : > { %v331_v36 = vmul.f32 %v319_v33, %v884_v60  ;;  %v332_v37 = vmul.f32 %v320_v34, %v886_v62  ;;  %v367_v40 = vmul.f32 %v319_v33, %v837_v9  ;;  %v368_v41 = vmul.f32 %v320_v34, %v840_v10 }
  0x9c   : > { %v359_v38 = vsub.f32 %v342_v35, %v331_v36  ;;  %v360_v39 = vsub.f32 %v342_v35, %v332_v37 }
  0x9e   : > { %v375_v42 = vadd.f32 %v367_v40, %v359_v38  ;;  %v376_v43 = vadd.f32 %v368_v41, %v360_v39  ;;  %v317_v44 = vpop.permute.xlu1 %316 }
  0x9f   : > { %v307_v45 = vpop.permute.xlu0 %306  ;;  %v325_v50 = vmul.f32 %v317_v44, %v284_v29  ;;  %v326_v9 = vmul.f32 %v317_v44, %v294_v30 }
  0xa0   : > { %383 = vst [vmem:[%s898_s22] sm:$0xff] %v375_v42  ;;  %v321_v46 = vmul.f32 %v307_v45, %v284_v29  ;;  %v322_v47 = vmul.f32 %v307_v45, %v294_v30 }
  0xa1   : > { %384 = vst [vmem:[%s898_s22 + $0x8] sm:$0xff] %v376_v43  ;;  %v337_v63 = vmul.f32 %v325_v50, %v884_v60  ;;  %v338_v0 = vmul.f32 %v326_v9, %v886_v62  ;;  %v374_v1 = vmul.f32 %v326_v9, %v875_v26 }
  0xa2   : > { %v333_v10 = vmul.f32 %v321_v46, %v884_v60  ;;  %v334_v51 = vmul.f32 %v322_v47, %v886_v62  ;;  %v369_v55 = vmul.f32 %v321_v46, %v843_v11  ;;  %v370_v56 = vmul.f32 %v322_v47, %v846_v12 }
  0xa3   : > { %v371_v11 = vmul.f32 %v323_v48, %v857_v17  ;;  %v373_v12 = vmul.f32 %v325_v50, %v872_v25 }
  0xa4   : > { %v361_v53 = vsub.f32 %v347_v52, %v333_v10  ;;  %v362_v54 = vsub.f32 %v347_v52, %v334_v51 }
  0xa6   : > { %v377_v59 = vadd.f32 %v369_v55, %v361_v53  ;;  %v378_v61 = vadd.f32 %v370_v56, %v362_v54  ;;  %v357_v2 = vpop.permute.xlu1 %356 }
  0xa7   : > { %v352_v3 = vpop.permute.xlu0 %351  ;;  %v365_v4 = vsub.f32 %v357_v2, %v337_v63  ;;  %v366_v60 = vsub.f32 %v357_v2, %v338_v0 }
  0xa8   : > { %385 = vst [vmem:[%s898_s22 + $0x10] sm:$0xff] %v377_v59  ;;  %v363_v62 = vsub.f32 %v352_v3, %v335_v57  ;;  %v364_v5 = vsub.f32 %v352_v3, %v336_v58 }
  0xa9   : > { %386 = vst [vmem:[%s898_s22 + $0x18] sm:$0xff] %v378_v61  ;;  %v381_v17 = vadd.f32 %v373_v12, %v365_v4  ;;  %v382_v25 = vadd.f32 %v374_v1, %v366_v60 }
  0xaa   : > { %v379_v26 = vadd.f32 %v371_v11, %v363_v62  ;;  %v380_v7 = vadd.f32 %v372_v6, %v364_v5 }
  0xab   : > { %389 = vst [vmem:[%s898_s22 + $0x30] sm:$0xff] %v381_v17 }
  0xac   : > { %390 = vst [vmem:[%s898_s22 + $0x38] sm:$0xff] %v382_v25 }
  0xad   : > { %387 = vst [vmem:[%s898_s22 + $0x20] sm:$0xff] %v379_v26 }
  0xae   : > { %388 = vst [vmem:[%s898_s22 + $0x28] sm:$0xff] %v380_v7 }
  0xaf   : > { %644 = shalt.err (!%p641_p13)
}
  0xb0   : > { %s704_s19 = smov 256   ;;  %s705_s28 = smov 16  }
  0xb1   : > { %515 = dma.vmem_to_hbm [thread:$0]  (%p777_p9), %s407_s5, 1024, %s409_s24, %s392_s6, %s704_s19, %s704_s19, %s705_s28  }
  0xb2 PF: > { %s423_s29 = sand.u32 1, %s679_s12   ;;  %p522_p0 = pnand %p499_p12, %p784_p11 }
  0xb3   : > { %s424_s22 = scalar_lea.sflag [#allocation4], %s423_s29 }
  0xb4   : > { %p523_p1 = pneg %p522_p0 }
  0xb6   : > { %674 = dma.done.wait (%p523_p1), %s424_s22, 1024  }
  0xb7   : > { %676 = vsyncadd (%p523_p1), %s424_s22, 4294966272  ;;  %s19_s17 = sadd.s32 1, %s699_s17   ;;  %s967_s12 = smov %s683_s13 }
  0xb8   : > { %p16_p2 = scmp.ge.s32.totalorder %s19_s17, 4   ;;  %s968_s13 = smov %s687_s14 }
  0xb9   : > { %s969_s14 = smov %s782_s26  ;;  %s970_s15 = smov %s695_s16 }
  0xba   : > { %s971_s16 = smov %s973_s20  ;;  %18 = sbr.rel (!%p16_p2) target bundleno = 6 (0x6), region = 77 }
  0xbf   :  { %430 = vsyncpa [#allocation3], 1 }
  0xc0   :  { %432 = vsyncpa [#allocation3 + $0x1], 1 }
  0xc1   :  { %433 = vsyncpa [#allocation4], 1 }
  0xc2   :  { %435 = vsyncpa [#allocation4 + $0x1], 1 }

</bundles_post_ra>
